<compile_context>
chip_gen: v6e
topology: v6e:2x2x1
jax: 0.10.0
libtpu: 0.0.40
codegen_flags: <defaults>
</compile_context>

<pallas_src>
import functools

import jax
import jax.numpy as jnp
from jax.experimental import pallas as pl
from jax.experimental.pallas import tpu as pltpu


def _lora_kernel(x_ref, a_ref, bt_ref, o_ref):
    """Eval path: o = x + (x @ A_scaled) @ B_T on one row tile."""
    x = x_ref[...]                                                   # (TM, in_f)
    y = jnp.dot(x, a_ref[...], preferred_element_type=jnp.float32)   # (TM, r)
    z = jnp.dot(y, bt_ref[...], preferred_element_type=jnp.float32)  # (TM, out_f)
    o_ref[...] = (x.astype(jnp.float32) + z).astype(o_ref.dtype)


def _lora_dropout_kernel(x_ref, a_ref, bt_ref, bits_ref, o_ref, *,
                         keep_scale, threshold):
    """Train path: o = x + dropout((x @ A_scaled) @ B_T) on one row tile."""
    x = x_ref[...]                                                   # (TM, in_f)
    y = jnp.dot(x, a_ref[...], preferred_element_type=jnp.float32)   # (TM, r)
    z = jnp.dot(y, bt_ref[...], preferred_element_type=jnp.float32)  # (TM, out_f)
    # Integer-threshold dropout mask; 1/(1-p) rescale fused into the kept branch.
    keep = bits_ref[...] >= jnp.uint32(threshold)
    z = jnp.where(keep, z * keep_scale, 0.0)
    o_ref[...] = (x.astype(jnp.float32) + z).astype(o_ref.dtype)


def _pick_tile_m(m_rows, in_f, out_f, itemsize, with_bits,
                 vmem_budget_bytes=24 * 1024 * 1024):
    """Largest row tile whose double-buffered streams fit a conservative VMEM
    budget (safe on v7x's 64 MiB VMEM as well as v5e/v6e)."""
    bytes_per_row = (in_f + out_f) * itemsize + (out_f * 4 if with_bits else 0)
    # 2x for pipeline double-buffering, 2x extra headroom.
    tile = vmem_budget_bytes // max(1, 4 * bytes_per_row)
    tile = max(8, min(512, tile))
    tile = (tile // 8) * 8                       # sublane-aligned
    rows8 = ((m_rows + 7) // 8) * 8
    return min(tile, rows8)


def lora_forward(x, lora_A, lora_B, *, lora_alpha=32.0, lora_dropout=0.1,
                 training=True, rng_key=None):
    """x: (..., in_features). Returns x + dropout((x @ A) @ B.T / alpha)."""
    orig_shape = x.shape
    in_f = orig_shape[-1]
    out_f, r = lora_B.shape
    assert lora_A.shape == (in_f, r)
    assert out_f == in_f, "residual add requires in_features == out_features"

    x2d = x.reshape(-1, in_f)
    m_rows = x2d.shape[0]

    apply_dropout = bool(training) and (float(lora_dropout) > 0.0)

    # One-time (tiny) weight plumbing: fold 1/alpha into A, pre-transpose B.
    a_scaled = lora_A * (1.0 / float(lora_alpha))          # (in_f, r)
    b_t = lora_B.T                                         # (r, out_f), lane-dense out

    tile_m = _pick_tile_m(m_rows, in_f, out_f, x.dtype.itemsize, apply_dropout)
    n_tiles = pl.cdiv(m_rows, tile_m)
    m_pad = n_tiles * tile_m
    if m_pad != m_rows:
        x2d = jnp.pad(x2d, ((0, m_pad - m_rows), (0, 0)))

    in_specs = [
        pl.BlockSpec((tile_m, in_f), lambda i: (i, 0)),     # x row tile
        pl.BlockSpec((in_f, r), lambda i: (0, 0)),          # A (resident)
        pl.BlockSpec((r, out_f), lambda i: (0, 0)),         # B.T (resident)
    ]
    inputs = [x2d, a_scaled, b_t]

    if apply_dropout:
        if rng_key is None:
            rng_key = jax.random.PRNGKey(0)
        bits = jax.random.bits(rng_key, (m_pad, out_f), dtype=jnp.uint32)
        in_specs.append(pl.BlockSpec((tile_m, out_f), lambda i: (i, 0)))
        inputs.append(bits)
        threshold = min(int(round(float(lora_dropout) * (2.0 ** 32))), 2 ** 32 - 1)
        kernel = functools.partial(
            _lora_dropout_kernel,
            keep_scale=1.0 / (1.0 - float(lora_dropout)),
            threshold=threshold,
        )
    else:
        kernel = _lora_kernel

    itemsize = x.dtype.itemsize
    cost = pl.CostEstimate(
        flops=2 * m_rows * in_f * r + 2 * m_rows * r * out_f,
        transcendentals=0,
        bytes_accessed=(m_rows * in_f * itemsize          # x in
                        + m_rows * out_f * itemsize       # out
                        + in_f * r * lora_A.dtype.itemsize
                        + r * out_f * lora_B.dtype.itemsize
                        + (m_rows * out_f * 4 if apply_dropout else 0)),
    )

    out2d = pl.pallas_call(
        kernel,
        out_shape=jax.ShapeDtypeStruct((m_pad, out_f), x.dtype),
        grid_spec=pltpu.PrefetchScalarGridSpec(
            num_scalar_prefetch=0,
            grid=(n_tiles,),
            in_specs=in_specs,
            out_specs=pl.BlockSpec((tile_m, out_f), lambda i: (i, 0)),
        ),
        compiler_params=pltpu.CompilerParams(
            dimension_semantics=("parallel",),             # megacore on v7x
            vmem_limit_bytes=48 * 1024 * 1024,
        ),
        cost_estimate=cost,
    )(*inputs)

    out2d = out2d[:m_rows]
    return out2d.reshape(orig_shape[:-1] + (out_f,))


if __name__ == "__main__":
    # Small shapes consistent with the module: in_features == out_features.
    batch, seq, hidden, r = 2, 8, 32, 8
    lora_alpha, lora_dropout = 32.0, 0.1

    key = jax.random.PRNGKey(0)
    kx, ka, kb, kd = jax.random.split(key, 4)
    x = jax.random.normal(kx, (batch, seq, hidden), dtype=jnp.float32)
    lora_A = jax.random.normal(ka, (hidden, r), dtype=jnp.float32)   # (in_f, r)
    lora_B = jax.random.normal(kb, (hidden, r), dtype=jnp.float32)   # (out_f, r)

    # Eval-mode forward (dropout = identity) — check against pure-JAX reference.
    out_eval = lora_forward(x, lora_A, lora_B, lora_alpha=lora_alpha,
                            lora_dropout=lora_dropout, training=False)
    jax.block_until_ready(out_eval)
    ref_eval = x + (x @ lora_A) @ lora_B.T / lora_alpha
    assert jnp.allclose(out_eval, ref_eval, atol=1e-4, rtol=1e-4), "eval mismatch"

    # Training-mode forward (dropout active, deterministic via rng_key).
    out_train = lora_forward(x, lora_A, lora_B, lora_alpha=lora_alpha,
                             lora_dropout=lora_dropout, training=True,
                             rng_key=kd)
    jax.block_until_ready(out_train)

    # Inverted-dropout semantics: every element is either the residual x
    # (dropped -> z = 0) or x + z/(1-p) (kept, rescaled).
    z = (x @ lora_A) @ lora_B.T / lora_alpha
    kept = x + z / (1.0 - lora_dropout)
    close_to_x = jnp.isclose(out_train, x, atol=1e-4, rtol=1e-4)
    close_to_kept = jnp.isclose(out_train, kept, atol=1e-4, rtol=1e-4)
    assert bool(jnp.all(close_to_x | close_to_kept)), "dropout semantics mismatch"

    print("KERNEL_OK")
</pallas_src>

<mosaic_0001>
module attributes {stable_mosaic.version = 11 : i64} {
  func.func @_lora_kernel(%arg0: i32, %arg1: memref<16x32xf32, #tpu.memory_space<vmem>>, %arg2: memref<32x8xf32, #tpu.memory_space<vmem>>, %arg3: memref<8x32xf32, #tpu.memory_space<vmem>>, %arg4: memref<16x32xf32, #tpu.memory_space<vmem>>) attributes {dimension_semantics = [#tpu.dimension_semantics<parallel>], iteration_bounds = array<i64: 1>, scalar_prefetch = 0 : i64, scratch_operands = 0 : i64, tpu.core_type = #tpu.core_type<tc>, window_params = [{transform_indices = @transform_0, window_bounds = array<i64: 16, 32>}, {pipeline_mode = #tpu.pipeline_mode<synchronous>, transform_indices = @transform_1, window_bounds = array<i64: 32, 8>}, {pipeline_mode = #tpu.pipeline_mode<synchronous>, transform_indices = @transform_2, window_bounds = array<i64: 8, 32>}, {transform_indices = @transform_3, window_bounds = array<i64: 16, 32>}]} {
    %c0 = arith.constant 0 : index
    %c0_0 = arith.constant 0 : index
    %0 = vector.load %arg1[%c0, %c0_0] : memref<16x32xf32, #tpu.memory_space<vmem>>, vector<16x32xf32>
    %c0_1 = arith.constant 0 : index
    %c0_2 = arith.constant 0 : index
    %1 = vector.load %arg2[%c0_1, %c0_2] : memref<32x8xf32, #tpu.memory_space<vmem>>, vector<32x8xf32>
    %cst = arith.constant dense<0.000000e+00> : vector<16x8xf32>
    %2 = tpu.matmul %0, %1, %cst {dimension_numbers = #tpu.dot_dimension_numbers<[1], [0], [0], [1], [0, 0, 1, 1], [], []>} : vector<16x32xf32>, vector<32x8xf32>, vector<16x8xf32> -> vector<16x8xf32>
    %c0_3 = arith.constant 0 : index
    %c0_4 = arith.constant 0 : index
    %3 = vector.load %arg3[%c0_3, %c0_4] : memref<8x32xf32, #tpu.memory_space<vmem>>, vector<8x32xf32>
    %cst_5 = arith.constant dense<0.000000e+00> : vector<16x32xf32>
    %4 = tpu.matmul %2, %3, %cst_5 {dimension_numbers = #tpu.dot_dimension_numbers<[1], [0], [0], [1], [0, 0, 1, 1], [], []>} : vector<16x8xf32>, vector<8x32xf32>, vector<16x32xf32> -> vector<16x32xf32>
    %5 = arith.addf %0, %4 : vector<16x32xf32>
    %c0_6 = arith.constant 0 : index
    %c0_7 = arith.constant 0 : index
    %6 = vector.load %arg4[%c0_6, %c0_7] : memref<16x32xf32, #tpu.memory_space<vmem>>, vector<16x32xf32>
    tpu.vector_store %arg4[%c0_6, %c0_7], %5 {strides = array<i32>} : memref<16x32xf32, #tpu.memory_space<vmem>>, vector<16x32xf32>,
    return
  }
  func.func @transform_0(%arg0: i32) -> (i32, i32) {
    %c0_i32 = arith.constant 0 : i32
    %c0_i32_0 = arith.constant 0 : i32
    return %arg0, %c0_i32 : i32, i32
  }
  func.func @transform_1(%arg0: i32) -> (i32, i32) {
    %c0_i32 = arith.constant 0 : i32
    %c0_i32_0 = arith.constant 0 : i32
    %c0_i32_1 = arith.constant 0 : i32
    return %c0_i32, %c0_i32_0 : i32, i32
  }
  func.func @transform_2(%arg0: i32) -> (i32, i32) {
    %c0_i32 = arith.constant 0 : i32
    %c0_i32_0 = arith.constant 0 : i32
    %c0_i32_1 = arith.constant 0 : i32
    return %c0_i32, %c0_i32_0 : i32, i32
  }
  func.func @transform_3(%arg0: i32) -> (i32, i32) {
    %c0_i32 = arith.constant 0 : i32
    %c0_i32_0 = arith.constant 0 : i32
    return %arg0, %c0_i32 : i32, i32
  }
}

</mosaic_0001>

<bundles_post_ra>
// kernel: tpu_custom_call.1
= control target key start
LH: loop header
LB: loop body
LE: loop exit
PB: predicated region body
PF: predicated region fallthrough
CT: control target
= control target key end

     0   :  { %vm21_vm0 = vcmask 261120   ;;  %s311_s0 = inlined_call_operand.vmem [shape: f32[16,32], index: 0, kind: input, shape index: {}]   ;;  %s312_s1 = inlined_call_operand.vmem [shape: f32[32,8], index: 1, kind: input, shape index: {}]   ;;  %s313_s2 = inlined_call_operand.vmem [shape: f32[8,32], index: 2, kind: input, shape index: {}]   ;;  %s314_s3 = inlined_call_operand.hbm [shape: f32[16,32], index: 3, kind: output, shape index: {}]  }
   0x1   :  { %v20_v0 = vld [vmem:[%s312_s1 + $0x18] sm:$0xff]  ;;  %v19_v1 = vld [vmem:[%s312_s1 + $0x10] sm:$0xff]  ;;  %v15_v2 = vld [vmem:[%s311_s0] sm:$0xff] }
   0x2   :  { %219 = vmatprep.subr.mxu0 %v20_v0  ;;  %v18_v3 = vld [vmem:[%s312_s1 + $0x8] sm:$0xff]  ;;  %227 = vmatprep.mubr.msk.f32.mxu0 %vm21_vm0, %v15_v2 }
   0x3   :  { %220 = vmatpush3.msra.mxu0 %v20_v0 }
   0x4   :  { %8 = vsyncpa [#allocation3], 0  ;;  %221 = vmatprep.subr.mxu0 %v19_v1  ;;  %v17_v4 = vld [vmem:[%s312_s1] sm:$0xff]  ;;  %v16_v5 = vld [vmem:[%s311_s0 + $0x8] sm:$0xff]  ;;  %vm104_vm1 = vcmask 64512   ;;  %s260_s1 = smov [#allocation2]  }
   0x5   :  { %222 = vmatpush3.msra.mxu0 %v19_v1  ;;  %v103_v6 = vld [vmem:[%s313_s2] sm:$0xff]  ;;  %s195_s26 = sshll.u32 %s260_s1, 4  ;;  %s196_s26 = int_to_ptr.vmem [resolvable:$true] %s195_s26 }
   0x6   :  { %223 = vmatprep.subr.mxu0 %v18_v3  ;;  %230 = vmatprep.subr.mxu1 %v103_v6  ;;  %s238_s0 = scalar_lea.vmem %s196_s26, 256  ;;  %p243_p1 = scmp.lt.s32.totalorder %s196_s26, %s196_s26 }
   0x7   :  { %224 = vmatpush3.msra.mxu0 %v18_v3  ;;  %231 = vmatpush3.msra.mxu1 %v103_v6  ;;  %p239_p0 = scmp.ne.s32.totalorder %s196_s26, %s238_s0  ;;  %p244_p2 = scmp.lt.s32.totalorder %s238_s0, %s238_s0 }
   0x8   :  { %225 = vmatprep.subr.mxu0 %v17_v4 }
   0x9   :  { %226 = vmatpush3.msra.mxu0 %v17_v4  ;;  %p245_p3 = por %p244_p2, %p243_p1 }
   0xa   :  { %228 = vmatmul.mubr.msk.f32.vlgmr.msra.gmra.mxu0 %vm21_vm0, %v16_v5 }
   0xb   :  { %p246_p4 = pnand %p245_p3, %p239_p0 }
  0xca   :  { %v229_v7 = vpop.f32.mrf.mxu0 }
  0xcc   :  { %v94_v8 = vpop.f32.mrf.mxu0 }
  0xcd   :  { %232 = vmatprep.mubr.msk.f32.mxu1 %vm104_vm1, %v94_v8 }
  0xce   :  { %233 = vmatmul.mubr.msk.f32.vlgmr.msra.gmra.mxu1 %vm104_vm1, %v229_v7 }
 0x18e   :  { %v234_v9 = vpop.f32.mrf.mxu1 }
 0x18f   :  { %v187_v10 = vadd.f32 %v234_v9, %v16_v5 }
 0x190   :  { %v177_v11 = vpop.f32.mrf.mxu1 }
 0x191   :  { %189 = vst.msk [vmem:[#allocation2 + $0x8] sm:$0xff] %vm21_vm0, %v187_v10  ;;  %v186_v12 = vadd.f32 %v177_v11, %v15_v2 }
 0x193   :  { %188 = vst.msk [vmem:[#allocation2] sm:$0xff] %vm21_vm0, %v186_v12 }
 0x194   :  { %249 = shalt.err (!%p246_p4)
}
 0x195   :  { %s261_s2 = smov 128   ;;  %s262_s27 = smov 8  }
 0x196   :  { %201 = dma.vmem_to_hbm [thread:$0]  %s196_s26, 256, %s314_s3, [#allocation3], %s261_s2, %s261_s2, %s262_s27  }
 0x197   :  { %258 = dma.done.wait [#allocation3], 256  }
 0x198   :  { %259 = vsyncadd [#allocation3], 4294967040 }
 0x199   :  { %205 = vsyncpa [#allocation3], 1 }

</bundles_post_ra>
